<compile_context>
chip_gen: v7x
topology: tpu7x:2x2x1
jax: 0.10.0
libtpu: 0.0.40
codegen_flags: <defaults>
</compile_context>

<pallas_src>
import functools

import jax
import jax.numpy as jnp
from jax.experimental import pallas as pl
from jax.experimental.pallas import tpu as pltpu


def _round_up(x, m):
    return ((x + m - 1) // m) * m


def _cdiv(a, b):
    return -(-a // b)


def _vmem_capacity_bytes():
    try:
        return int(pltpu.get_tpu_info().vmem_capacity_bytes)
    except Exception:
        return 64 * 1024 * 1024  # v7x per-TensorCore VMEM -- most conservative


def _pick_tiling(B, D, Kp, HW, max_tile_m):
    """VMEM-aware lane-tile selection with minimal spatial padding."""
    HW128 = _round_up(max(HW, 128), 128)

    # VMEM budget with headroom for compiler scratch / pipeline buffers.
    budget = int(_vmem_capacity_bytes() * 0.55)
    # Per-lane-column f32 bytes: x + q pipeline copies (2 bufs each), idx/sse
    # temporaries, and ~5 live (Kp, TM) slabs (wx/score, iota, cmp, one-hot).
    per_col = 4 * (4 * D + 3) + 5 * Kp * 4
    # Grid-invariant residents: codebook (possibly double-buffered) + norms.
    fixed = 4 * (2 * D * Kp + 2 * Kp) + (1 << 20)
    tm_cap = max(128, ((budget - fixed) // per_col) // 128 * 128)

    tm = min(_round_up(min(max_tile_m, HW128), 128), tm_cap)
    tm = max(tm, 128)
    n_tiles = _cdiv(HW128, tm)
    # Re-balance so the last tile is not mostly padding (tiles stay 128-aligned).
    tm = _round_up(_cdiv(HW128, n_tiles), 128)
    n_tiles = _cdiv(HW128, tm)
    # v7x megacore: make sure a batch-1 call still has >= 2 grid steps.
    if B * n_tiles < 2 and HW128 >= 256:
        n_tiles = 2
        tm = _round_up(_cdiv(HW128, n_tiles), 128)
    return tm, n_tiles


def _vq_kernel(x_ref, wt_ref, wsqh_ref, q_ref, idx_ref, sse_ref, *, hw):
    """One lane-dense column tile of the channel-major (B, D, H*W) input.

    x_ref:    (D,  TM) f32  -- input columns (channel-major slab of NCHW)
    wt_ref:   (D,  Kp) f32  -- codebook transposed, zero-padded to Kp codes
    wsqh_ref: (Kp,  1) f32  -- 0.5 * per-code squared norms (pad rows = +huge)
    q_ref:    (D,  TM) f32  -- quantized output columns
    idx_ref:  (1,  TM) i32  -- argmin codebook indices
    sse_ref:  (8, 128) f32  -- per-tile sum over valid columns of ||q - x||^2
    """
    x = x_ref[...]                                             # (D, TM)
    wt = wt_ref[...]                                           # (D, Kp)
    wsqh = wsqh_ref[...]                                       # (Kp, 1)

    # argmin_k ||x_m - w_k||^2 == argmin_k (0.5*||w_k||^2 - w_k . x_m):
    # the per-column ||x_m||^2 constant is dropped, and the remaining terms use
    # one MXU matmul plus a single (Kp, TM) subtract.
    wx = jax.lax.dot_general(
        wt, x, (((0,), (0,)), ((), ())),
        preferred_element_type=jnp.float32,
        precision=jax.lax.Precision.HIGHEST)                   # (Kp, TM)
    score = wsqh - wx                                          # (Kp, TM)

    kp, tm = score.shape
    # First-occurrence argmin over the codebook (sublane) axis, like torch.argmin.
    # TODO(synk): NaN distances would make the one-hot all-zero (column -> 0),
    # which differs from torch.argmin's NaN behavior.
    min_s = jnp.min(score, axis=0, keepdims=True)              # (1, TM)
    k_iota = jax.lax.broadcasted_iota(jnp.int32, score.shape, 0)
    idx2 = jnp.min(jnp.where(score == min_s, k_iota, kp), axis=0, keepdims=True)
    idx_ref[...] = idx2.astype(jnp.int32)

    # Gather selected code vectors on the MXU: (D, Kp) @ onehot(Kp, TM) -> (D, TM)
    onehot = (k_iota == idx2).astype(jnp.float32)
    q = jnp.dot(wt, onehot, preferred_element_type=jnp.float32,
                precision=jax.lax.Precision.HIGHEST)
    q_ref[...] = q

    # Fused per-tile squared error; padded tail columns are masked so they
    # cannot pollute the loss.  One (8,128) tile per grid step instead of a
    # per-column row keeps the loss write stream tiny.
    diff = q - x
    sse_cols = jnp.sum(diff * diff, axis=0, keepdims=True)     # (1, TM)
    col = pl.program_id(1) * tm + jax.lax.broadcasted_iota(jnp.int32, (1, tm), 1)
    sse_cols = jnp.where(col < hw, sse_cols, 0.0)
    total = jnp.sum(sse_cols, axis=1, keepdims=True)           # (1, 1)
    sse_ref[...] = jnp.broadcast_to(total, sse_ref.shape)


def _vq_channel_major(x3, embeddings, *, max_tile_m=2048):
    """Run the VQ kernel over the channel-major (B, D, H*W) input."""
    B, D, HW = x3.shape
    K = embeddings.shape[0]

    # Pad codebook rows to a sublane multiple; pad rows can never win argmin.
    Kp = _round_up(K, 8)
    tm, n_tiles = _pick_tiling(B, D, Kp, HW, max_tile_m)
    HWp = tm * n_tiles
    if HWp != HW:
        x3 = jnp.pad(x3, ((0, 0), (0, 0), (0, HWp - HW)))

    # Grid-invariant codebook prep hoisted out of the kernel: transposed /
    # zero-padded codes plus 0.5*||w||^2 (pad rows get +huge).
    emb = embeddings.astype(jnp.float32)
    w_t = jnp.zeros((D, Kp), jnp.float32).at[:, :K].set(emb.T)
    w_sqh = jnp.full((Kp, 1), 1e30, dtype=jnp.float32)
    w_sqh = w_sqh.at[:K, 0].set(0.5 * jnp.sum(emb * emb, axis=1))

    # Single-buffer the grid-invariant codebook operands once they are big
    # enough for double-buffering to matter (saves VMEM at large K); tiny
    # codebooks keep the default (zero-risk) pipeline behavior.
    codebook_bytes = 4 * D * Kp
    cb_kwargs = {"pipeline_mode": pl.Buffered(1)} if codebook_bytes > (1 << 20) else {}

    # Rough VMEM usage estimate -> explicit scoped-VMEM limit (with headroom).
    est = (4 * (4 * D + 3) + 5 * Kp * 4) * tm + 4 * (2 * D * Kp + 2 * Kp) + (1 << 20)
    vmem_limit = min(int(_vmem_capacity_bytes() * 0.9),
                     max(32 << 20, int(est * 1.5)))

    kernel = functools.partial(_vq_kernel, hw=HW)

    q3, idx3, sse4 = pl.pallas_call(
        kernel,
        out_shape=(
            jax.ShapeDtypeStruct((B, D, HWp), jnp.float32),
            jax.ShapeDtypeStruct((B, 1, HWp), jnp.int32),
            jax.ShapeDtypeStruct((B, n_tiles, 8, 128), jnp.float32),
        ),
        grid_spec=pltpu.PrefetchScalarGridSpec(
            num_scalar_prefetch=0,
            grid=(B, n_tiles),
            in_specs=[
                pl.BlockSpec((None, D, tm), lambda b, j: (b, 0, j)),        # x tile
                pl.BlockSpec((D, Kp), lambda b, j: (0, 0), **cb_kwargs),    # codebook^T
                pl.BlockSpec((Kp, 1), lambda b, j: (0, 0), **cb_kwargs),    # 0.5*||w||^2
            ],
            out_specs=[
                pl.BlockSpec((None, D, tm), lambda b, j: (b, 0, j)),        # quantized
                pl.BlockSpec((None, 1, tm), lambda b, j: (b, 0, j)),        # indices
                pl.BlockSpec((None, None, 8, 128), lambda b, j: (b, j, 0, 0)),  # sse/tile
            ],
        ),
        compiler_params=pltpu.CompilerParams(
            dimension_semantics=("parallel", "parallel"),
            vmem_limit_bytes=vmem_limit,
        ),
    )(x3, w_t, w_sqh)

    # Slice away any spatial padding; sse is already per-tile scalars.
    return q3[:, :, :HW], idx3[:, 0, :HW], sse4[:, :, 0, 0]


class VectorQuantizer:
    """JAX/Pallas re-implementation of the PyTorch VectorQuantizer forward."""

    def __init__(self, num_embeddings, embedding_dim, commitment_cost, *, key):
        self.num_embeddings = num_embeddings
        self.embedding_dim = embedding_dim
        self.commitment_cost = commitment_cost
        # nn.Embedding weight, uniform_(-1/K, 1/K), deterministic init
        self.embeddings = jax.random.uniform(
            key,
            (num_embeddings, embedding_dim),
            dtype=jnp.float32,
            minval=-1.0 / num_embeddings,
            maxval=1.0 / num_embeddings,
        )

    @functools.partial(jax.jit, static_argnums=0)
    def __call__(self, x):
        # x: (B, C, H, W) float32 with C == embedding_dim (PyTorch NCHW input)
        B, C, H, W = x.shape
        assert C == self.embedding_dim

        # Channel-major flatten is a free reshape of NCHW -- no transposes.
        x3 = x.reshape(B, C, H * W)
        q3, idx, sse_tiles = _vq_channel_major(x3, self.embeddings)

        quantized = q3.reshape(B, C, H, W)            # already NCHW

        # Loss from fused per-tile partial sums (padded columns already masked).
        # Forward values: e_latent_loss == q_latent_loss == MSE(quantized, x).
        mse = jnp.sum(sse_tiles) / (B * C * H * W)
        loss = (1.0 + self.commitment_cost) * mse
        # TODO(synk): straight-through estimator / detach() semantics only affect
        # gradients; forward value of x + (quantized - x).detach() is `quantized`.

        encoding_indices = idx                        # (B, H*W) int32 (torch: int64)
        return quantized, loss, encoding_indices


if __name__ == "__main__":
    key = jax.random.PRNGKey(0)
    k_emb, k_x = jax.random.split(key)

    num_embeddings = 32
    embedding_dim = 8
    commitment_cost = 0.25

    vq = VectorQuantizer(num_embeddings, embedding_dim, commitment_cost, key=k_emb)

    # Small deterministic input: B=2, C=embedding_dim=8, H=W=16 -> 512 pixels
    x = jax.random.normal(k_x, (2, embedding_dim, 16, 16), dtype=jnp.float32)

    quantized, loss, indices = vq(x)
    jax.block_until_ready((quantized, loss, indices))

    # Pure-JAX reference of the same math (NHWC path), full matmul precision.
    x_nhwc = jnp.transpose(x, (0, 2, 3, 1))
    flat = x_nhwc.reshape(-1, embedding_dim)
    w = vq.embeddings
    # argmin of the full distance ||x||^2 + ||w||^2 - 2 w.x is equivalent to
    # argmin of 0.5*||w||^2 - w.x (used here in full precision for a clean check).
    score_ref = (0.5 * jnp.sum(w ** 2, axis=1)
                 - jnp.matmul(flat, w.T, precision=jax.lax.Precision.HIGHEST))
    idx_ref = jnp.argmin(score_ref, axis=1)
    q_ref = w[idx_ref].reshape(x_nhwc.shape)
    loss_ref = (1.0 + commitment_cost) * jnp.mean((q_ref - x_nhwc) ** 2)

    assert quantized.shape == x.shape
    assert indices.shape == (2, 16 * 16)
    assert jnp.all(indices.reshape(-1) == idx_ref)
    assert jnp.allclose(quantized, jnp.transpose(q_ref, (0, 3, 1, 2)),
                        atol=1e-5, rtol=1e-5)
    assert jnp.allclose(loss, loss_ref, atol=1e-5, rtol=1e-5)

    print("KERNEL_OK")
</pallas_src>

<mosaic_0001>
module attributes {stable_mosaic.version = 11 : i64} {
  func.func @_vq_kernel(%arg0: i32, %arg1: i32, %arg2: memref<1x8x256xf32, #tpu.memory_space<vmem>>, %arg3: memref<8x32xf32, #tpu.memory_space<vmem>>, %arg4: memref<32x1xf32, #tpu.memory_space<vmem>>, %arg5: memref<1x8x256xf32, #tpu.memory_space<vmem>>, %arg6: memref<1x1x256xi32, #tpu.memory_space<vmem>>, %arg7: memref<1x1x8x128xf32, #tpu.memory_space<vmem>>) attributes {dimension_semantics = [#tpu.dimension_semantics<parallel>, #tpu.dimension_semantics<parallel>], iteration_bounds = array<i64: 2, 1>, scalar_prefetch = 0 : i64, scratch_operands = 0 : i64, tpu.core_type = #tpu.core_type<tc>, window_params = [{transform_indices = @transform_0, window_bounds = array<i64: 1, 8, 256>}, {pipeline_mode = #tpu.pipeline_mode<synchronous>, transform_indices = @transform_1, window_bounds = array<i64: 8, 32>}, {pipeline_mode = #tpu.pipeline_mode<synchronous>, transform_indices = @transform_2, window_bounds = array<i64: 32, 1>}, {transform_indices = @transform_3, window_bounds = array<i64: 1, 8, 256>}, {transform_indices = @transform_4, window_bounds = array<i64: 1, 1, 256>}, {transform_indices = @transform_5, window_bounds = array<i64: 1, 1, 8, 128>}]} {
    %c0 = arith.constant 0 : index
    %c0_0 = arith.constant 0 : index
    %c0_1 = arith.constant 0 : index
    %0 = vector.load %arg2[%c0, %c0_0, %c0_1] : memref<1x8x256xf32, #tpu.memory_space<vmem>>, vector<1x8x256xf32>
    %1 = vector.shape_cast %0 : vector<1x8x256xf32> to vector<8x256xf32>
    %c0_2 = arith.constant 0 : index
    %c0_3 = arith.constant 0 : index
    %2 = vector.load %arg3[%c0_2, %c0_3] : memref<8x32xf32, #tpu.memory_space<vmem>>, vector<8x32xf32>
    %c0_4 = arith.constant 0 : index
    %c0_5 = arith.constant 0 : index
    %3 = vector.load %arg4[%c0_4, %c0_5] : memref<32x1xf32, #tpu.memory_space<vmem>>, vector<32x1xf32>
    %cst = arith.constant dense<0.000000e+00> : vector<32x256xf32>
    %4 = tpu.matmul %2, %1, %cst {dimension_numbers = #tpu.dot_dimension_numbers<[0], [0], [1], [1], [0, 1, 1, 1], [], []>, precision = #tpu.contract_precision<fp32>} : vector<8x32xf32>, vector<8x256xf32>, vector<32x256xf32> -> vector<32x256xf32>
    %5 = vector.broadcast %3 : vector<32x1xf32> to vector<32x256xf32>
    %6 = arith.subf %5, %4 : vector<32x256xf32>
    %cst_6 = arith.constant dense<0x7F800000> : vector<256xf32>
    %7 = vector.multi_reduction <minimumf>, %6, %cst_6 [0] : vector<32x256xf32> to vector<256xf32>
    %8 = vector.shape_cast %7 : vector<256xf32> to vector<1x256xf32>
    %9 = tpu.iota {dimensions = array<i32: 0>} : vector<32x256xi32>
    %10 = vector.broadcast %8 : vector<1x256xf32> to vector<32x256xf32>
    %11 = arith.cmpf oeq, %6, %10 : vector<32x256xf32>
    %c32_i32 = arith.constant 32 : i32
    %12 = vector.broadcast %c32_i32 : i32 to vector<32x256xi32>
    %13 = arith.select %11, %9, %12 : vector<32x256xi1>, vector<32x256xi32>
    %cst_7 = arith.constant dense<2147483647> : vector<256xi32>
    %14 = vector.multi_reduction <minsi>, %13, %cst_7 [0] : vector<32x256xi32> to vector<256xi32>
    %15 = vector.shape_cast %14 : vector<256xi32> to vector<1x256xi32>
    %c0_8 = arith.constant 0 : index
    %c0_9 = arith.constant 0 : index
    %c0_10 = arith.constant 0 : index
    %16 = vector.load %arg6[%c0_8, %c0_9, %c0_10] : memref<1x1x256xi32, #tpu.memory_space<vmem>>, vector<1x1x256xi32>
    %17 = vector.shape_cast %16 : vector<1x1x256xi32> to vector<1x256xi32>
    %18 = vector.shape_cast %15 : vector<1x256xi32> to vector<1x1x256xi32>
    tpu.vector_store %arg6[%c0_8, %c0_9, %c0_10], %18 {strides = array<i32>} : memref<1x1x256xi32, #tpu.memory_space<vmem>>, vector<1x1x256xi32>,
    %19 = vector.broadcast %15 : vector<1x256xi32> to vector<32x256xi32>
    %20 = arith.cmpi eq, %9, %19 : vector<32x256xi32>
    %21 = arith.extui %20 : vector<32x256xi1> to vector<32x256xi32>
    %22 = arith.sitofp %21 : vector<32x256xi32> to vector<32x256xf32>
    %cst_11 = arith.constant dense<0.000000e+00> : vector<8x256xf32>
    %23 = tpu.matmul %2, %22, %cst_11 {dimension_numbers = #tpu.dot_dimension_numbers<[1], [0], [0], [1], [0, 0, 1, 1], [], []>, precision = #tpu.contract_precision<fp32>} : vector<8x32xf32>, vector<32x256xf32>, vector<8x256xf32> -> vector<8x256xf32>
    %c0_12 = arith.constant 0 : index
    %c0_13 = arith.constant 0 : index
    %c0_14 = arith.constant 0 : index
    %24 = vector.load %arg5[%c0_12, %c0_13, %c0_14] : memref<1x8x256xf32, #tpu.memory_space<vmem>>, vector<1x8x256xf32>
    %25 = vector.shape_cast %24 : vector<1x8x256xf32> to vector<8x256xf32>
    %26 = vector.shape_cast %23 : vector<8x256xf32> to vector<1x8x256xf32>
    tpu.vector_store %arg5[%c0_12, %c0_13, %c0_14], %26 {strides = array<i32>} : memref<1x8x256xf32, #tpu.memory_space<vmem>>, vector<1x8x256xf32>,
    %27 = arith.subf %23, %1 : vector<8x256xf32>
    %28 = arith.mulf %27, %27 : vector<8x256xf32>
    %cst_15 = arith.constant dense<0.000000e+00> : vector<256xf32>
    %29 = vector.multi_reduction <add>, %28, %cst_15 [0] : vector<8x256xf32> to vector<256xf32>
    %30 = vector.shape_cast %29 : vector<256xf32> to vector<1x256xf32>
    %c256_i32 = arith.constant 256 : i32
    %31 = arith.muli %arg1, %c256_i32 : i32
    %32 = tpu.iota {dimensions = array<i32: 1>} : vector<1x256xi32>
    %33 = vector.broadcast %31 : i32 to vector<1x256xi32>
    %34 = arith.addi %33, %32 : vector<1x256xi32>
    %c256_i32_16 = arith.constant 256 : i32
    %35 = vector.broadcast %c256_i32_16 : i32 to vector<1x256xi32>
    %36 = arith.cmpi slt, %34, %35 : vector<1x256xi32>
    %cst_17 = arith.constant 0.000000e+00 : f32
    %37 = vector.broadcast %cst_17 : f32 to vector<1x256xf32>
    %38 = arith.select %36, %30, %37 : vector<1x256xi1>, vector<1x256xf32>
    %cst_18 = arith.constant dense<0.000000e+00> : vector<1xf32>
    %39 = vector.multi_reduction <add>, %38, %cst_18 [1] : vector<1x256xf32> to vector<1xf32>
    %40 = vector.shape_cast %39 : vector<1xf32> to vector<1x1xf32>
    %41 = vector.shape_cast %40 : vector<1x1xf32> to vector<1x1xf32>
    %42 = vector.broadcast %41 : vector<1x1xf32> to vector<8x128xf32>
    %c0_19 = arith.constant 0 : index
    %c0_20 = arith.constant 0 : index
    %c0_21 = arith.constant 0 : index
    %c0_22 = arith.constant 0 : index
    %43 = vector.load %arg7[%c0_19, %c0_20, %c0_21, %c0_22] : memref<1x1x8x128xf32, #tpu.memory_space<vmem>>, vector<1x1x8x128xf32>
    %44 = vector.shape_cast %43 : vector<1x1x8x128xf32> to vector<8x128xf32>
    %45 = vector.shape_cast %42 : vector<8x128xf32> to vector<1x1x8x128xf32>
    tpu.vector_store %arg7[%c0_19, %c0_20, %c0_21, %c0_22], %45 {strides = array<i32>} : memref<1x1x8x128xf32, #tpu.memory_space<vmem>>, vector<1x1x8x128xf32>,
    return
  }
  func.func @transform_0(%arg0: i32, %arg1: i32) -> (i32, i32, i32) {
    %c0_i32 = arith.constant 0 : i32
    %c0_i32_0 = arith.constant 0 : i32
    return %arg0, %c0_i32, %arg1 : i32, i32, i32
  }
  func.func @transform_1(%arg0: i32, %arg1: i32) -> (i32, i32) {
    %c0_i32 = arith.constant 0 : i32
    %c0_i32_0 = arith.constant 0 : i32
    %c0_i32_1 = arith.constant 0 : i32
    return %c0_i32, %c0_i32_0 : i32, i32
  }
  func.func @transform_2(%arg0: i32, %arg1: i32) -> (i32, i32) {
    %c0_i32 = arith.constant 0 : i32
    %c0_i32_0 = arith.constant 0 : i32
    %c0_i32_1 = arith.constant 0 : i32
    return %c0_i32, %c0_i32_0 : i32, i32
  }
  func.func @transform_3(%arg0: i32, %arg1: i32) -> (i32, i32, i32) {
    %c0_i32 = arith.constant 0 : i32
    %c0_i32_0 = arith.constant 0 : i32
    return %arg0, %c0_i32, %arg1 : i32, i32, i32
  }
  func.func @transform_4(%arg0: i32, %arg1: i32) -> (i32, i32, i32) {
    %c0_i32 = arith.constant 0 : i32
    %c0_i32_0 = arith.constant 0 : i32
    return %arg0, %c0_i32, %arg1 : i32, i32, i32
  }
  func.func @transform_5(%arg0: i32, %arg1: i32) -> (i32, i32, i32, i32) {
    %c0_i32 = arith.constant 0 : i32
    %c0_i32_0 = arith.constant 0 : i32
    %c0_i32_1 = arith.constant 0 : i32
    return %arg0, %arg1, %c0_i32, %c0_i32_0 : i32, i32, i32, i32
  }
}

</mosaic_0001>

<bundles_post_ra>
// kernel: a_call__.1
= control target key start
LH: loop header
LB: loop body
LE: loop exit
PB: predicated region body
PF: predicated region fallthrough
CT: control target
= control target key end

     0   :  { %s2096_s18 = smov 0   ;;  %s2098_s19 = smov 0   ;;  %s2406_s0 = inlined_call_operand.vmem [shape: f32[2,8,256], index: 0, kind: input, shape index: {}]   ;;  %s2407_s1 = inlined_call_operand.vmem [shape: f32[8,32], index: 1, kind: input, shape index: {}]   ;;  %s2408_s2 = inlined_call_operand.vmem [shape: f32[32,1], index: 2, kind: input, shape index: {}]   ;;  %s2409_s3 = inlined_call_operand.vmem [shape: f32[2,8,256], index: 3, kind: output, shape index: {0}]   ;;  %s2410_s4 = inlined_call_operand.vmem [shape: s32[2,1,256], index: 4, kind: output, shape index: {1}]   ;;  %s2411_s5 = inlined_call_operand.vmem [shape: f32[2,1,8,128], index: 5, kind: output, shape index: {2}]  }
   0x1   :  { %s2100_s20 = smov 0  }
   0x2 LB: > { %s28_s21 = sadd.s32 1, %s2056_s19  ;;  %p1865_p0 = scmp.ge.s32.totalorder %s2060_s20, 1  ;;  %s2060_s20 = sphi %s2100_s20, %s16_s20   ;;  %s2056_s19 = sphi %s2098_s19, %s2423_s19   ;;  %s2052_s18 = sphi %s2096_s18, %s2422_s18  }
   0x3   : > { %p30_p1 = scmp.ge.s32.totalorder %s28_s21, 2  ;;  %p217_p2 = scmp.lt.s32.totalorder %s2060_s20, 3 }
   0x5   : > { %s2425_s21 = smov (%p30_p1, %s28_s21), 0  ;;  %p218_p3 = pnand %p1865_p0, %p217_p2 }
   0x6   : > { %v2117_v0 = vld [vmem:[%s2407_s1] sm:$0xff] (!%p218_p3)  ;;  %p269_p4 = scmp.lt.s32.totalorder (!%p218_p3), %s2052_s18, 1  ;;  %v2062_v1 = vmov (!%p218_p3), 0.0   ;;  %v308_v14 = vld [vmem:[%s2408_s2 + $0x8] sm:$0xff] (!%p218_p3)  ;;  %v2063_v16 = vmov (!%p218_p3), 0   ;;  %v309_v17 = vld [vmem:[%s2408_s2 + $0x10] sm:$0xff] (!%p218_p3) }
   0x7   : > { %221 = sbr.rel (%p218_p3) target bundleno = 887 (0x377), region = 32  ;;  %311 = vxpose.xlu0.b32.start.end [1/1] (short) (narrow) (!%p218_p3), %v2117_v0, 32  ;;  %541 = vmatprep.mubr.f32.mxu0 (!%p218_p3), %v2062_v1  ;;  %v307_v15 = vld [vmem:[%s2408_s2] sm:$0xff] (!%p218_p3)  ;;  %v310_v18 = vld [vmem:[%s2408_s2 + $0x18] sm:$0xff] (!%p218_p3)  ;;  %vm343_vm0 = vcmask (!%p218_p3), 64512   ;;  %vm1109_vm1 = vcmask (!%p218_p3), 261120  }
   0x8   : > { %422 = vmatprep.mubr.f32.mxu1 (!%p218_p3), %v2062_v1  ;;  %2037 = vset.pattern.permute.xlu1 (!%p218_p3), %v2063_v16 }
   0x9   : > { %975 = vperm.xlu1 (!%p218_p3), %2037, %v308_v14  }
   0xd   : > { %980 = vperm.xlu1 (!%p218_p3), %2037, %v309_v17  }
   0xe   : > { %s2427_s18 = smov (!%p269_p4, %s2052_s18), 1 }
   0xf   : > { %s1906_s24 = sshll.u32 %s2427_s18, 4  ;;  %s1870_s11 = sshll.u32 %s2427_s18, 1 }
  0x10   : > { %s276_s27 = scalar_lea.vmem %s2406_s0, %s1906_s24  ;;  %s295_s14 = scalar_lea.vmem %s2410_s4, %s1870_s11 }
  0x11   : > { %v2130_v2 = vld [vmem:[%s276_s27 + $0x8] sm:$0xff]  ;;  %v2132_v3 = vld [vmem:[%s276_s27] sm:$0xff]  ;;  %985 = vperm.xlu1 %2037, %v310_v18   ;;  %s286_s17 = scalar_lea.vmem %s2409_s3, %s1906_s24  ;;  %s1871_s22 = sshll.u32 %s2427_s18, 3 }
  0x12   : > { %v2135_v4 = vand.u32 4294901760, %v2130_v2  ;;  %v2138_v5 = vand.u32 4294901760, %v2132_v3  ;;  %s303_s25 = scalar_lea.vmem %s2411_s5, %s1871_s22 }
  0x14   : > { %v468_v6 = vsub.f32 %v2130_v2, %v2135_v4  ;;  %v2144_v7 = vsub.f32 %v2132_v3, %v2138_v5  ;;  %357 = vmatprep.subr.mxu1 %v2135_v4 }
  0x15   : > { %359 = vmatpush1.msra.mxu1 %v2138_v5 }
  0x16   : > { %v469_v8 = vand.u32 4294901760, %v468_v6  ;;  %v475_v9 = vand.u32 4294901760, %v2144_v7 }
  0x18   : > { %v470_v10 = vsub.f32 %v468_v6, %v469_v8  ;;  %v476_v11 = vsub.f32 %v2144_v7, %v475_v9 }
  0x1a   : > { %v471_v12 = vand.u32 4294901760, %v470_v10  ;;  %v477_v13 = vand.u32 4294901760, %v476_v11 }
  0x1c   : > { %472 = vmatprep.subr.mxu0 %v471_v12  ;;  %1956 = vmatprep.subr.mxu1 %v471_v12 }
  0x1d   : > { %478 = vmatpush1.msra.mxu0 %v477_v13 }
  0x1e   : > { %572 = vmatprep.subr.mxu0 %v468_v6 }
  0x30   : > { %2036 = vset.pattern.permute.xlu0 %v2063_v16 }
  0x3c   : > { %970 = vperm.xlu0 %2036, %v307_v15  }
  0x87   : > { %v327_v19 = vpop.trf.xlu0 }
  0x88   : > { %v345_v20 = vsel %vm343_vm0, %v327_v19, 0  ;;  %v976_v58 = vpop.permute.xlu1 %975 }
  0x89   : > { %v2165_v21 = vand.u32 4294901760, %v345_v20 }
  0x8b   : > { %v424_v22 = vsub.f32 %v345_v20, %v2165_v21  ;;  %v328_v23 = vpop.trf.xlu0  ;;  %543 = vmatmul.mubr.f32.vlgmr.msra.gmra.mrb[0].mxu0 %v2165_v21 }
  0x8c   : > { %v348_v24 = vsel %vm343_vm0, %v328_v23, 0  ;;  %575 = vmatpush1.msra.mxu0 %v2144_v7  ;;  %638 = vmatprep.mubr.f32.mxu0 %v2062_v1 }
  0x8d   : > { %v425_v25 = vand.u32 4294901760, %v424_v22  ;;  %v2172_v26 = vand.u32 4294901760, %v348_v24  ;;  %672 = vmatprep.subr.mxu0 %v2135_v4 }
  0x8f   : > { %v435_v27 = vsub.f32 %v348_v24, %v2172_v26  ;;  %v329_v28 = vpop.trf.xlu0  ;;  %v426_v29 = vsub.f32 %v424_v22, %v425_v25 }
  0x90   : > { %v351_v30 = vsel %vm343_vm0, %v329_v28, 0 }
  0x91   : > { %v436_v31 = vand.u32 4294901760, %v435_v27  ;;  %v445_v32 = vand.u32 4294901760, %v351_v30  ;;  %v427_v33 = vand.u32 4294901760, %v426_v29 }
  0x93   : > { %v446_v34 = vsub.f32 %v351_v30, %v445_v32  ;;  %v330_v35 = vpop.trf.xlu0  ;;  %428 = vmatmul.mubr.f32.vlgmr.msra.gmra.mrb[0].mxu1 %v427_v33  ;;  %641 = vmatmul.mubr.f32.vlgmr.msra.gmra.mrb[0].mxu0 %v424_v22  ;;  %v437_v36 = vsub.f32 %v435_v27, %v436_v31  ;;  %v1014_v30 = vlaneseq }
  0x94   : > { %v354_v37 = vsel %vm343_vm0, %v330_v35, 0  ;;  %433 = vmatprep.mubr.f32.mxu1 %v2062_v1  ;;  %646 = vmatprep.mubr.f32.mxu0 %v2062_v1 }
  0x95   : > { %v447_v38 = vand.u32 4294901760, %v446_v34  ;;  %v456_v39 = vand.u32 4294901760, %v354_v37  ;;  %674 = vmatpush1.msra.mxu0 %v2138_v5  ;;  %v438_v40 = vand.u32 4294901760, %v437_v36  ;;  %1957 = vmatpush1.msra.mxu1 %v477_v13  ;;  %v2212_v36 = vshrl.u32 %v1014_v30, 7 }
  0x96   : > { %777 = vmatprep.subr.mxu0 %v469_v8 }
  0x97   : > { %v457_v41 = vsub.f32 %v354_v37, %v456_v39  ;;  %439 = vmatmul.mubr.f32.gmra.mrb[2].mxu1 %v438_v40  ;;  %649 = vmatmul.mubr.f32.gmra.mrb[2].mxu0 %v435_v27  ;;  %v448_v42 = vsub.f32 %v446_v34, %v447_v38 }
  0x98   : > { %444 = vmatprep.mubr.f32.mxu1 %v2062_v1  ;;  %654 = vmatprep.mubr.f32.mxu0 %v2062_v1 }
  0x99   : > { %v458_v43 = vand.u32 4294901760, %v457_v41  ;;  %v449_v44 = vand.u32 4294901760, %v448_v42  ;;  %v2217_v42 = vadd.s32 8, %v2212_v36 }
  0x9b   : > { %450 = vmatmul.mubr.f32.gmra.mrb[4].mxu1 %v449_v44  ;;  %657 = vmatmul.mubr.f32.gmra.mrb[4].mxu0 %v446_v34  ;;  %v459_v45 = vsub.f32 %v457_v41, %v458_v43  ;;  %v1111_v34 = vsel %vm1109_vm1, %v2117_v0, 0  ;;  %v2223_v44 = vadd.s32 24, %v2212_v36 }
  0x9c   : > { %455 = vmatprep.mubr.f32.mxu1 %v2062_v1  ;;  %662 = vmatprep.mubr.f32.mxu0 %v2062_v1 }
  0x9d   : > { %v460_v46 = vand.u32 4294901760, %v459_v45 }
  0x9f   : > { %461 = vmatmul.mubr.f32.gmra.mrb[6].mxu1 %v460_v46  ;;  %665 = vmatmul.mubr.f32.gmra.mrb[6].mxu0 %v457_v41 }
  0xa0   : > { %548 = vmatprep.mubr.f32.mxu1 %v2062_v1  ;;  %737 = vmatprep.mubr.f32.mxu0 %v2062_v1 }
  0xa3   : > { %550 = vmatmul.mubr.f32.vlgmr.msra.gmra.mrb[2].mxu1 %v2172_v26  ;;  %741 = vmatmul.mubr.f32.vlgmr.msra.gmra.mrb[0].mxu0 %v425_v25 }
  0xa4   : > { %555 = vmatprep.mubr.f32.mxu1 %v2062_v1  ;;  %746 = vmatprep.mubr.f32.mxu0 %v2062_v1 }
  0xa5   : > { %781 = vmatpush1.msra.mxu0 %v475_v9 }
  0xa6   : > { %874 = vmatprep.subr.mxu0 %v2135_v4 }
  0xa7   : > { %557 = vmatmul.mubr.f32.gmra.mrb[4].mxu1 %v445_v32  ;;  %750 = vmatmul.mubr.f32.gmra.mrb[2].mxu0 %v436_v31 }
  0xa8   : > { %562 = vmatprep.mubr.f32.mxu1 %v2062_v1  ;;  %755 = vmatprep.mubr.f32.mxu0 %v2062_v1 }
  0xab   : > { %564 = vmatmul.mubr.f32.gmra.mrb[6].mxu1 %v456_v39  ;;  %759 = vmatmul.mubr.f32.gmra.mrb[4].mxu0 %v447_v38 }
  0xac   : > { %764 = vmatprep.mubr.f32.mxu0 %v2062_v1  ;;  %1185 = vmatprep.mubr.f32.mxu1 %v2062_v1 }
  0xaf   : > { %768 = vmatmul.mubr.f32.gmra.mrb[6].mxu0 %v458_v43  ;;  %v2220_v43 = vadd.s32 16, %v2212_v36 }
  0xb0   : > { %844 = vmatprep.mubr.f32.mxu0 %v2062_v1 }
  0xb3   : > { %846 = vmatmul.mubr.f32.vlgmr.msra.gmra.mrb[0].mxu0 %v2165_v21 }
  0xb4   : > { %851 = vmatprep.mubr.f32.mxu0 %v2062_v1  ;;  %876 = vmatpush1.msra.mxu0 %v2138_v5  ;;  %v981_v5 = vpop.permute.xlu1 %980 }
  0xb7   : > { %853 = vmatmul.mubr.f32.gmra.mrb[2].mxu0 %v2172_v26 }
  0xb8   : > { %858 = vmatprep.mubr.f32.mxu0 %v2062_v1  ;;  %v986_v18 = vpop.permute.xlu1 %985 }
  0xbb   : > { %860 = vmatmul.mubr.f32.gmra.mrb[4].mxu0 %v445_v32  ;;  %v971_v4 = vpop.permute.xlu0 %970 }
  0xbc   : > { %865 = vmatprep.mubr.f32.mxu0 %v2062_v1 }
  0xbf   : > { %867 = vmatmul.mubr.f32.gmra.mrb[6].mxu0 %v456_v39 }
  0xc0   : > { %939 = vmatprep.mubr.f32.mxu0 %v2062_v1 }
  0xc3   : > { %941 = vmatmul.mubr.f32.vlgmr.msra.gmra.mrb[0].mxu0 %v2165_v21 }
  0xc4   : > { %946 = vmatprep.mubr.f32.mxu0 %v2062_v1 }
  0xc7   : > { %948 = vmatmul.mubr.f32.gmra.mrb[2].mxu0 %v2172_v26 }
  0xc8   : > { %953 = vmatprep.mubr.f32.mxu0 %v2062_v1 }
  0xcb   : > { %955 = vmatmul.mubr.f32.gmra.mrb[4].mxu0 %v445_v32 }
  0xcc   : > { %960 = vmatprep.mubr.f32.mxu0 %v2062_v1 }
  0xcf   : > { %962 = vmatmul.mubr.f32.gmra.mrb[6].mxu0 %v456_v39  ;;  %v2214_v39 = vand.u32 4294901760, %v1111_v34 }
  0xd1   : > { %v2226_v46 = vsub.f32 %v1111_v34, %v2214_v39 }
 0x166   : > { %v429_v47 = vpop.f32.mrb[0].mxu1 }
 0x167   : > { %v431_v48 = vpop.f32.mrb[1].mxu1 }
 0x176   : > { %v551_v49 = vpop.f32.mrb[2].mxu1 }
 0x177   : > { %v553_v50 = vpop.f32.mrb[3].mxu1 }
 0x17a   : > { %v558_v51 = vpop.f32.mrb[4].mxu1 }
 0x17b   : > { %v560_v52 = vpop.f32.mrb[5].mxu1 }
 0x17e   : > { %v565_v53 = vpop.f32.mrb[6].mxu1 }
 0x17f   : > { %v567_v54 = vpop.f32.mrb[7].mxu1 }
 0x196   : > { %v942_v55 = vpop.f32.mrb[0].mxu0 }
 0x197   : > { %v1958_v56 = vadd.f32 %v942_v55, %v429_v47  ;;  %v944_v57 = vpop.f32.mrb[1].mxu0 }
 0x198   : > { %v1959_v59 = vadd.f32 %v944_v57, %v431_v48 }
 0x199   : > { %v988_v10 = vsub.f32 %v971_v4, %v1958_v56 }
 0x19a   : > { %v949_v60 = vpop.f32.mrb[2].mxu0  ;;  %v989_v12 = vsub.f32 %v971_v4, %v1959_v59 }
 0x19b   : > { %v1960_v61 = vadd.f32 %v949_v60, %v551_v49  ;;  %v951_v62 = vpop.f32.mrb[3].mxu0 }
 0x19c   : > { %v1961_v63 = vadd.f32 %v951_v62, %v553_v50  ;;  %v1188_v62 = vand.u32 4294901760, %v2226_v46 }
 0x19d   : > { %v990_v21 = vsub.f32 %v976_v58, %v1960_v61 }
 0x19e   : > { %v956_v6 = vpop.f32.mrb[4].mxu0  ;;  %v991_v23 = vsub.f32 %v976_v58, %v1961_v63 }
 0x19f   : > { %v1962_v7 = vadd.f32 %v956_v6, %v558_v51  ;;  %v958_v8 = vpop.f32.mrb[5].mxu0 }
 0x1a0   : > { %v1963_v9 = vadd.f32 %v958_v8, %v560_v52 }
 0x1a1   : > { %v992_v11 = vsub.f32 %v981_v5, %v1962_v7 }
 0x1a2   : > { %v993_v13 = vsub.f32 %v981_v5, %v1963_v9  ;;  %v963_v14 = vpop.f32.mrb[6].mxu0  ;;  %v2064_v5 = vmov 1966171168   ;;  %v2240_v9 = vsub.f32 %v2226_v46, %v1188_v62 }
 0x1a3   : > { %v996_v15 = vmin.f32 %v988_v10, %v992_v11  ;;  %v1964_v16 = vadd.f32 %v963_v14, %v565_v53  ;;  %v965_v17 = vpop.f32.mrb[7].mxu0  ;;  %v1067_v6 = vunpack.c.l.s4 %v2064_v5 }
 0x1a4   : > { %v1005_v19 = vmin.f32 %v989_v12, %v993_v13  ;;  %v1965_v20 = vadd.f32 %v965_v17, %v567_v54 }
 0x1a5   : > { %v994_v22 = vsub.f32 %v986_v18, %v1964_v16 }
 0x1a6   : > { %v995_v24 = vsub.f32 %v986_v18, %v1965_v20 }
 0x1a7   : > { %v997_v25 = vmin.f32 %v990_v21, %v994_v22 }
 0x1a8   : > { %v1006_v26 = vmin.f32 %v991_v23, %v995_v24 }
 0x1a9   : > { %v998_v27 = vmin.f32 %v996_v15, %v997_v25  ;;  %v1190_v15 = vand.u32 4294901760, %v2240_v9 }
 0x1aa   : > { %v1007_v28 = vmin.f32 %v1005_v19, %v1006_v26 }
 0x1ab   : > { %v999_v29 = vrot.slane %v998_v27, 4 }
 0x1ac   : > { %v1008_v31 = vrot.slane %v1007_v28, 4 }
 0x1ad   : > { %v1000_v32 = vmin.f32 %v998_v27, %v999_v29 }
 0x1ae   : > { %v1009_v33 = vmin.f32 %v1007_v28, %v1008_v31 }
 0x1af   : > { %v1001_v35 = vrot.slane %v1000_v32, 2 }
 0x1b0   : > { %v1010_v37 = vrot.slane %v1009_v33, 2 }
 0x1b1   : > { %v1002_v38 = vmin.f32 %v1000_v32, %v1001_v35  ;;  %v2065_v35 = vmov 1.0|1.0  }
 0x1b2   : > { %v1011_v40 = vmin.f32 %v1009_v33, %v1010_v37 }
 0x1b3   : > { %v1003_v41 = vrot.slane %v1002_v38, 1 }
 0x1b4   : > { %v1012_v0 = vrot.slane %v1011_v40, 1 }
 0x1b5   : > { %v1004_v45 = vmin.f32 %v1002_v38, %v1003_v41 }
 0x1b6   : > { %v1013_v47 = vmin.f32 %v1011_v40, %v1012_v0 }
 0x1b7   : > { %vm1019_vm2 = vcmp.eq.f32.partialorder %v988_v10, %v1004_v45  ;;  %vm1021_vm3 = vcmp.eq.f32.partialorder %v990_v21, %v1004_v45  ;;  %vm1023_vm4 = vcmp.eq.f32.partialorder %v992_v11, %v1004_v45  ;;  %vm1025_vm5 = vcmp.eq.f32.partialorder %v994_v22, %v1004_v45 }
 0x1b8   : > { %v1027_v48 = vsel %vm1019_vm2, %v2212_v36, 32  ;;  %v1029_v49 = vsel %vm1021_vm3, %v2217_v42, 32  ;;  %v1031_v50 = vsel %vm1023_vm4, %v2220_v43, 32  ;;  %v1033_v51 = vsel %vm1025_vm5, %v2223_v44, 32 }
 0x1b9   : > { %vm1035_vm6 = vcmp.lt.s32.totalorder %v1027_v48, %v1031_v50  ;;  %vm1037_vm7 = vcmp.lt.s32.totalorder %v1029_v49, %v1033_v51  ;;  %vm1020_vm8 = vcmp.eq.f32.partialorder %v989_v12, %v1013_v47  ;;  %vm1022_vm9 = vcmp.eq.f32.partialorder %v991_v23, %v1013_v47 }
 0x1ba   : > { %v1036_v52 = vsel %vm1035_vm6, %v1027_v48, %v1031_v50  ;;  %v1038_v53 = vsel %vm1037_vm7, %v1029_v49, %v1033_v51  ;;  %vm1024_vm10 = vcmp.eq.f32.partialorder %v993_v13, %v1013_v47  ;;  %vm1026_vm11 = vcmp.eq.f32.partialorder %v995_v24, %v1013_v47 }
 0x1bb   : > { %vm1039_vm12 = vcmp.lt.s32.totalorder %v1036_v52, %v1038_v53  ;;  %v1028_v54 = vsel %vm1020_vm8, %v2212_v36, 32  ;;  %v1030_v55 = vsel %vm1022_vm9, %v2217_v42, 32  ;;  %v1032_v56 = vsel %vm1024_vm10, %v2220_v43, 32 }
 0x1bc   : > { %v1040_v57 = vsel %vm1039_vm12, %v1036_v52, %v1038_v53  ;;  %v1034_v58 = vsel %vm1026_vm11, %v2223_v44, 32  ;;  %vm1050_vm13 = vcmp.lt.s32.totalorder %v1028_v54, %v1032_v56  ;;  %v1068_v12 = vunpack.c.0.s8 %v1067_v6 }
 0x1bd   : > { %v1041_v59 = vrot.slane %v1040_v57, 4  ;;  %v1051_v60 = vsel %vm1050_vm13, %v1028_v54, %v1032_v56  ;;  %vm1052_vm14 = vcmp.lt.s32.totalorder %v1030_v55, %v1034_v58  ;;  %vm2258_vm10 = vcmp.lt.s32.totalorder %v1014_v30, 256 }
 0x1be   : > { %v1053_v61 = vsel %vm1052_vm14, %v1030_v55, %v1034_v58  ;;  %v1071_v18 = vsub.s32 %v1068_v12, %v2212_v36 }
 0x1bf   : > { %vm1042_vm15 = vcmp.lt.s32.totalorder %v1040_v57, %v1041_v59  ;;  %vm1054_vm0 = vcmp.lt.s32.totalorder %v1051_v60, %v1053_v61 }
 0x1c0   : > { %v1043_v63 = vsel %vm1042_vm15, %v1040_v57, %v1041_v59  ;;  %v1055_v4 = vsel %vm1054_vm0, %v1051_v60, %v1053_v61 }
 0x1c1   : > { %v1044_v7 = vrot.slane %v1043_v63, 2  ;;  %v1056_v8 = vrot.slane %v1055_v4, 4 }
 0x1c3   : > { %vm1045_vm1 = vcmp.lt.s32.totalorder %v1043_v63, %v1044_v7  ;;  %vm1057_vm2 = vcmp.lt.s32.totalorder %v1055_v4, %v1056_v8 }
 0x1c4   : > { %v1046_v10 = vsel %vm1045_vm1, %v1043_v63, %v1044_v7  ;;  %v1058_v11 = vsel %vm1057_vm2, %v1055_v4, %v1056_v8 }
 0x1c5   : > { %v1047_v13 = vrot.slane %v1046_v10, 1  ;;  %v1059_v14 = vrot.slane %v1058_v11, 2 }
 0x1c7   : > { %vm1060_vm3 = vcmp.lt.s32.totalorder %v1058_v11, %v1059_v14  ;;  %vm1048_vm4 = vcmp.lt.s32.totalorder %v1046_v10, %v1047_v13 }
 0x1c8   : > { %v1061_v16 = vsel %vm1060_vm3, %v1058_v11, %v1059_v14  ;;  %v1049_v17 = vsel %vm1048_vm4, %v1046_v10, %v1047_v13 }
 0x1c9   : > { %v1062_v19 = vrot.slane %v1061_v16, 1  ;;  %vm1085_vm5 = vcmp.eq.s32.totalorder %v2212_v36, %v1049_v17  ;;  %vm1087_vm6 = vcmp.eq.s32.totalorder %v2217_v42, %v1049_v17  ;;  %vm1089_vm7 = vcmp.eq.s32.totalorder %v2220_v43, %v1049_v17 }
 0x1ca   : > { %v1872_v20 = vsel %vm1085_vm5, 1.0, %v2062_v1  ;;  %v1874_v21 = vsel %vm1087_vm6, 1.0, %v2062_v1  ;;  %vm1091_vm8 = vcmp.eq.s32.totalorder %v2223_v44, %v1049_v17  ;;  %v1876_v22 = vsel %vm1089_vm7, 1.0, %v2062_v1  ;;  %vm2298_vm0 = vmpackc.low %vm1087_vm6, %vm1085_vm5 }
 0x1cb   : > { %vm1063_vm9 = vcmp.lt.s32.totalorder %v1061_v16, %v1062_v19  ;;  %v2262_v24 = vsub.f32 %v1872_v20, %v1872_v20  ;;  %v1878_v25 = vsel %vm1091_vm8, 1.0, %v2062_v1  ;;  %v2267_v27 = vsub.f32 %v1874_v21, %v1874_v21  ;;  %vm2331_vm2 = vmpackc.low %vm1091_vm8, %vm1089_vm7 }
 0x1cc   : > { %v1064_v26 = vsel %vm1063_vm9, %v1061_v16, %v1062_v19  ;;  %v2269_v28 = vsub.f32 %v1876_v22, %v1876_v22  ;;  %v2271_v29 = vsub.f32 %v1878_v25, %v1878_v25 }
 0x1cd   : > { %vm1086_vm11 = vcmp.eq.s32.totalorder %v2212_v36, %v1064_v26  ;;  %vm1088_vm12 = vcmp.eq.s32.totalorder %v2217_v42, %v1064_v26  ;;  %v1065_v30 = vcombine.low %v1049_v17, %v1064_v26  ;;  %vm1090_vm13 = vcmp.eq.s32.totalorder %v2220_v43, %v1064_v26 }
 0x1ce   : > { %v1873_v31 = vsel %vm1086_vm11, 1.0, %v2062_v1  ;;  %v1875_v32 = vsel %vm1088_vm12, 1.0, %v2062_v1  ;;  %vm2279_vm14 = vmpackc.low %vm1088_vm12, %vm1086_vm11  ;;  %vm1092_vm15 = vcmp.eq.s32.totalorder %v2223_v44, %v1064_v26  ;;  %v1877_v34 = vsel %vm1090_vm13, 1.0, %v2062_v1 }
 0x1cf   : > { %1909 = vmatprep.subr.msk.bf16.mxu1 %vm2279_vm14, %v2065_v35  ;;  %v2290_v37 = vsub.f32 %v1873_v31, %v1873_v31  ;;  %v2292_v38 = vsub.f32 %v1875_v32, %v1875_v32  ;;  %v1072_v40 = vrot.slane %v1065_v30, %v1071_v18  ;;  %v1879_v0 = vsel %vm1092_vm15, 1.0, %v2062_v1  ;;  %vm2311_vm1 = vmpackc.low %vm1092_vm15, %vm1090_vm13 }
 0x1d0   : > { %1911 = vmatpush1.bf16.msk.msra.mxu1 %vm2298_vm0, %v2065_v35  ;;  %v1222_v42 = vsub.f32 %v1877_v34, %v1877_v34  ;;  %v1234_v45 = vsub.f32 %v1879_v0, %v1879_v0  ;;  %v1205_v47 = vand.u32 4294901760, %v2262_v24  ;;  %v1217_v48 = vand.u32 4294901760, %v2267_v27 }
 0x1d1   : > { %v1079_v49 = vrot.slane %v1072_v40, %v1071_v18  ;;  %1913 = vmatprep.subr.msk.bf16.mxu1 %vm2311_vm1, %v2065_v35  ;;  %v1199_v50 = vand.u32 4294901760, %v2290_v37  ;;  %v1211_v51 = vand.u32 4294901760, %v2292_v38  ;;  %v1229_v52 = vand.u32 4294901760, %v2269_v28 }
 0x1d2   : > { %v1206_v53 = vsub.f32 %v2262_v24, %v1205_v47  ;;  %v1218_v54 = vsub.f32 %v2267_v27, %v1217_v48  ;;  %v1223_v55 = vand.u32 4294901760, %v1222_v42  ;;  %v1235_v56 = vand.u32 4294901760, %v1234_v45 }
 0x1d3   : > { %1084 = vst.msk [vmem:[%s295_s14] sm:$0x3] %vm2258_vm10, %v1079_v49  ;;  %v1200_v58 = vsub.f32 %v2290_v37, %v1199_v50  ;;  %v1212_v59 = vsub.f32 %v2292_v38, %v1211_v51  ;;  %v1230_v60 = vsub.f32 %v2269_v28, %v1229_v52  ;;  %v1241_v61 = vand.u32 4294901760, %v2271_v29 }
 0x1d4   : > { %1915 = vmatpush1.bf16.msk.msra.mxu1 %vm2331_vm2, %v2065_v35  ;;  %v1207_v63 = vand.u32 4294901760, %v1206_v53  ;;  %v1219_v43 = vand.u32 4294901760, %v1218_v54  ;;  %v1224_v4 = vsub.f32 %v1222_v42, %v1223_v55  ;;  %v1236_v44 = vsub.f32 %v1234_v45, %v1235_v56 }
 0x1d5   : > { %v1201_v5 = vand.u32 4294901760, %v1200_v58  ;;  %v1213_v6 = vand.u32 4294901760, %v1212_v59  ;;  %v1242_v7 = vsub.f32 %v2271_v29, %v1241_v61  ;;  %v1231_v13 = vand.u32 4294901760, %v1230_v60 }
 0x1d6   : > { %v1225_v8 = vand.u32 4294901760, %v1224_v4  ;;  %v1237_v10 = vand.u32 4294901760, %v1236_v44  ;;  %v1918_v12 = vpack.c.bf16 %v1219_v43, %v1207_v63  ;;  %v1924_v18 = vpack.c.bf16 %v2292_v38, %v2290_v37 }
 0x1d7   : > { %1191 = vmatmul.mubr.f32.vlgmr.msra.gmra.mrb[8].mxu1 %v1190_v15  ;;  %v1916_v11 = vpack.c.bf16 %v1213_v6, %v1201_v5  ;;  %v1243_v14 = vand.u32 4294901760, %v1242_v7  ;;  %v1926_v9 = vpack.c.bf16 %v2267_v27, %v2262_v24  ;;  %v1928_v15 = vpack.c.bf16 %v1234_v45, %v1222_v42 }
 0x1d8   : > { %1301 = vmatprep.mubr.f32.mxu1 %v2062_v1  ;;  %v1920_v16 = vpack.c.bf16 %v1237_v10, %v1225_v8  ;;  %v1930_v19 = vpack.c.bf16 %v2271_v29, %v2269_v28  ;;  %v1940_v20 = vpack.c.bf16 %v1211_v51, %v1199_v50  ;;  %v1942_v21 = vpack.c.bf16 %v1217_v48, %v1205_v47 }
 0x1d9   : > { %1917 = vmatprep.subr.bf16.mxu1 %v1916_v11  ;;  %v1922_v17 = vpack.c.bf16 %v1243_v14, %v1231_v13  ;;  %v1944_v22 = vpack.c.bf16 %v1235_v56, %v1223_v55  ;;  %v1946_v23 = vpack.c.bf16 %v1241_v61, %v1229_v52 }
 0x1da   : > { %1919 = vmatpush1.bf16.msra.mxu1 %v1918_v12 }
 0x1db   : > { %1921 = vmatprep.subr.bf16.mxu1 %v1920_v16 }
 0x1de   : > { %1923 = vmatpush1.bf16.msra.mxu1 %v1922_v17 }
 0x1df   : > { %1925 = vmatprep.subr.bf16.mxu1 %v1924_v18 }
 0x1e1   : > { %1303 = vmatmul.mubr.f32.vlgmr.msra.gmra.mrb[8].mxu1 %v2214_v39 }
 0x1e2   : > { %1927 = vmatpush1.bf16.msra.mxu1 %v1926_v9  ;;  %1389 = vmatprep.mubr.f32.mxu1 %v2062_v1 }
 0x1e3   : > { %1929 = vmatprep.subr.bf16.mxu1 %v1928_v15 }
 0x1e6   : > { %1931 = vmatpush1.bf16.msra.mxu1 %v1930_v19 }
 0x1e7   : > { %1933 = vmatprep.subr.msk.bf16.mxu1 %vm2279_vm14, %v2065_v35 }
 0x1e9   : > { %1392 = vmatmul.mubr.f32.vlgmr.msra.gmra.mrb[8].mxu1 %v2226_v46 }
 0x1ea   : > { %1935 = vmatpush1.bf16.msk.msra.mxu1 %vm2298_vm0, %v2065_v35  ;;  %1470 = vmatprep.mubr.f32.mxu1 %v2062_v1 }
 0x1eb   : > { %1937 = vmatprep.subr.msk.bf16.mxu1 %vm2311_vm1, %v2065_v35 }
 0x1ee   : > { %1939 = vmatpush1.bf16.msk.msra.mxu1 %vm2331_vm2, %v2065_v35 }
 0x1ef   : > { %1941 = vmatprep.subr.bf16.mxu1 %v1940_v20 }
 0x1f1   : > { %1474 = vmatmul.mubr.f32.vlgmr.msra.gmra.mrb[8].mxu1 %v1188_v62 }
 0x1f2   : > { %1943 = vmatpush1.bf16.msra.mxu1 %v1942_v21  ;;  %1568 = vmatprep.mubr.f32.mxu1 %v2062_v1 }
 0x1f3   : > { %1945 = vmatprep.subr.bf16.mxu1 %v1944_v22 }
 0x1f6   : > { %1947 = vmatpush1.bf16.msra.mxu1 %v1946_v23 }
 0x1f7   : > { %1949 = vmatprep.subr.msk.bf16.mxu1 %vm2279_vm14, %v2065_v35 }
 0x1f9   : > { %1570 = vmatmul.mubr.f32.vlgmr.msra.gmra.mrb[8].mxu1 %v2214_v39 }
 0x1fa   : > { %1951 = vmatpush1.bf16.msk.msra.mxu1 %vm2298_vm0, %v2065_v35  ;;  %1648 = vmatprep.mubr.f32.mxu1 %v2062_v1 }
 0x1fb   : > { %1953 = vmatprep.subr.msk.bf16.mxu1 %vm2311_vm1, %v2065_v35 }
 0x1fe   : > { %1955 = vmatpush1.bf16.msk.msra.mxu1 %vm2331_vm2, %v2065_v35 }
 0x201   : > { %1650 = vmatmul.mubr.f32.vlgmr.msra.gmra.mrb[8].mxu1 %v2214_v39 }
 0x2d4   : > { %v1651_v46 = vpop.f32.mrb[8].mxu1 }
 0x2d5   : > { %v1658_v62 = vsub.f32 %v1651_v46, %v2132_v3  ;;  %v1653_v24 = vpop.f32.mrb[9].mxu1  ;;  %1656 = vst [vmem:[%s286_s17] sm:$0xff] %v1651_v46 }
 0x2d6   : > { %1657 = vst [vmem:[%s286_s17 + $0x8] sm:$0xff] %v1653_v24  ;;  %v1659_v1 = vsub.f32 %v1653_v24, %v2130_v2 }
 0x2d7   : > { %v1660_v25 = vmul.f32 %v1658_v62, %v1658_v62 }
 0x2d8   : > { %v1661_v26 = vmul.f32 %v1659_v1, %v1659_v1 }
 0x2d9   : > { %v1662_v27 = vrot.slane %v1660_v25, 4 }
 0x2da   : > { %v1668_v28 = vrot.slane %v1661_v26, 4 }
 0x2db   : > { %v1663_v29 = vadd.f32 %v1662_v27, %v1660_v25 }
 0x2dc   : > { %v1669_v39 = vadd.f32 %v1668_v28, %v1661_v26 }
 0x2dd   : > { %v1664_v30 = vrot.slane %v1663_v29, 2 }
 0x2de   : > { %v1670_v31 = vrot.slane %v1669_v39, 2 }
 0x2df   : > { %v1665_v32 = vadd.f32 %v1664_v30, %v1663_v29 }
 0x2e0   : > { %v1671_v33 = vadd.f32 %v1670_v31, %v1669_v39 }
 0x2e1   : > { %v1666_v34 = vrot.slane %v1665_v32, 1 }
 0x2e2   : > { %v1672_v35 = vrot.slane %v1671_v33, 1 }
 0x2e3   : > { %v1667_v37 = vadd.f32 %v1666_v34, %v1665_v32 }
 0x2e4   : > { %v1673_v3 = vadd.f32 %v1672_v35, %v1671_v33 }
 0x2e6   : > { %v1685_v38 = vadd.f32 %v1673_v3, %v1667_v37 }
 0x2e8   : > { %1686 = vadd.xlane.f32.xlu1 %v1685_v38 }
 0x375   : > { %v1687_v2 = vpop.xlane.xlu1 %1686 }
 0x376   : > { %1688 = vst [vmem:[%s303_s25] sm:$0xff] %v1687_v2 }
 0x377 PF: > { %s16_s20 = sadd.s32 1, %s2060_s20   ;;  %s2422_s18 = smov %s2056_s19 }
 0x378   : > { %p13_p5 = scmp.ge.s32.totalorder %s16_s20, 4   ;;  %s2423_s19 = smov %s2425_s21 }
 0x37a   :  { %15 = sbr.rel (!%p13_p5) target bundleno = 2 (0x2), region = 86 }

</bundles_post_ra>
